<compile_context>
chip_gen: v5e
topology: v5e:2x2
jax: 0.10.0
libtpu: 0.0.40
codegen_flags: <defaults>
</compile_context>

<pallas_src>
import math

import jax
import jax.numpy as jnp
from jax import lax
from jax.experimental import pallas as pl
from jax.experimental.pallas import tpu as pltpu


def weather_mlp_kernel(x_ref, w1_ref, w2_ref, w3_ref, w4c_ref, b_ref, o_ref):
    """One batch tile. x_ref: (TILE_B, F) natural layout; o_ref: (1, TILE_B)."""
    # Bias offsets derived from the (out, in) weight shapes (no hard-coded 64/32/16/1).
    n1 = w1_ref.shape[0]
    n2 = w2_ref.shape[0]
    n3 = w3_ref.shape[0]
    n4 = w4c_ref.shape[1]
    b1 = b_ref[0:n1, :]                                   # (64, 1)
    b2 = b_ref[n1:n1 + n2, :]                             # (32, 1)
    b3 = b_ref[n1 + n2:n1 + n2 + n3, :]                   # (16, 1)
    b4 = b_ref[n1 + n2 + n3:n1 + n2 + n3 + n4, :]         # (1, 1)

    # Layer 1: contract the feature axis of the natural-layout x block against the
    # PyTorch (out, in) weight -> result is already lane-dense (64, TILE_B); the
    # small transpose is folded into the MXU feed instead of a wrapper HBM pass.
    h1 = lax.dot_general(w1_ref[...], x_ref[...],
                         dimension_numbers=(((1,), (1,)), ((), ())),
                         preferred_element_type=jnp.float32) + b1
    h1 = jnp.maximum(h1, 0.0)                                           # (64, TB)

    # Layers 2-3 stay in (features, batch) orientation on the MXU, f32 accumulation.
    h2 = jnp.dot(w2_ref[...], h1.astype(w2_ref.dtype),
                 preferred_element_type=jnp.float32) + b2
    h2 = jnp.maximum(h2, 0.0)                                           # (32, TB)
    h3 = jnp.dot(w3_ref[...], h2.astype(w3_ref.dtype),
                 preferred_element_type=jnp.float32) + b3
    h3 = jnp.maximum(h3, 0.0)                                           # (16, TB)

    # Final 16 -> 1 layer off the MXU: VPU multiply + XLU sublane reduce.
    # Result is a lane-dense (1, TB) row -> unmasked full-width store.
    y = jnp.sum(h3 * w4c_ref[...], axis=0, keepdims=True) + b4          # (1, TB)
    o_ref[...] = y.astype(o_ref.dtype)


def _auto_tile_b(batch, *, cap=4096, min_tiles=8):
    """>= min_tiles grid steps (pipelining + v7x dual-TC split), 128-lane multiple,
    capped so double-buffered x blocks + f32 intermediates fit every generation's
    scoped-VMEM default (16 MiB v5e, 32 MiB v6e/v7x)."""
    t = -(-batch // min_tiles)          # ceil(batch / min_tiles)
    t = -(-t // 128) * 128              # round up to a lane multiple
    return max(128, min(cap, t))


def weather_model_forward(x, kparams, *, tile_b=None, compute_dtype=jnp.float32):
    """x: (B, input_size) f32 (natural layout).  Returns (B, 1) f32."""
    B, F = x.shape
    if tile_b is None:
        tile_b = _auto_tile_b(B)
    assert tile_b % 128 == 0, "tile_b must be a multiple of 128 (lane-dense blocks)"
    num_tiles = pl.cdiv(B, tile_b)      # ragged tail handled by Pallas OOB masking

    x = x.astype(compute_dtype)                          # no-op when already f32
    w1 = kparams["w1"].astype(compute_dtype)             # (64, F)  PyTorch (out, in)
    w2 = kparams["w2"].astype(compute_dtype)             # (32, 64)
    w3 = kparams["w3"].astype(compute_dtype)             # (16, 32)
    w4c = kparams["w4_col"]                              # (16, 1) f32 (VPU path)
    b_packed = kparams["b_packed"]                       # (padded, 1) f32

    # Constant block index -> weights/biases stay VMEM-resident across grid steps.
    const = lambda a: pl.BlockSpec(a.shape, lambda i: (0, 0))

    out = pl.pallas_call(
        weather_mlp_kernel,
        out_shape=jax.ShapeDtypeStruct((1, B), jnp.float32),
        grid=(num_tiles,),
        in_specs=[pl.BlockSpec((tile_b, F), lambda i: (i, 0)),
                  const(w1), const(w2), const(w3), const(w4c), const(b_packed)],
        out_specs=pl.BlockSpec((1, tile_b), lambda i: (0, i)),
        compiler_params=pltpu.CompilerParams(
            dimension_semantics=("parallel",)),   # v7x: shard batch tiles across both TCs
    )(x, w1, w2, w3, w4c, b_packed)

    return out.reshape(B, 1)


def init_params(key, input_size):
    """PyTorch nn.Linear layout: weight (out, in), bias (out,), U(-1/sqrt(fan_in), +)."""
    dims = [(input_size, 64), (64, 32), (32, 16), (16, 1)]
    params = {}
    keys = jax.random.split(key, 2 * len(dims))
    for i, (fan_in, fan_out) in enumerate(dims):
        bound = 1.0 / math.sqrt(fan_in)
        params[f"w{i+1}"] = jax.random.uniform(
            keys[2 * i], (fan_out, fan_in), jnp.float32, -bound, bound)
        params[f"b{i+1}"] = jax.random.uniform(
            keys[2 * i + 1], (fan_out,), jnp.float32, -bound, bound)
    return params


def pack_kernel_params(params):
    """Kernel-side param prep: fc4 weight as a (16, 1) column (VPU path) and all
    four biases packed (sublane-major) into a single array.  Offsets are derived
    from the weight shapes so layer-size changes can't silently misalign."""
    widths = []
    for i in range(1, 5):
        w_out = params[f"w{i}"].shape[0]
        assert params[f"b{i}"].shape == (w_out,), f"bias/weight mismatch at layer {i}"
        widths.append(w_out)
    total = sum(widths)
    padded = -(-total // 8) * 8                       # round rows up to a sublane multiple
    b_packed = jnp.zeros((padded, 1), jnp.float32)
    off = 0
    for i, w in enumerate(widths):
        b_packed = b_packed.at[off:off + w, 0].set(params[f"b{i+1}"])
        off += w
    return {"w1": params["w1"], "w2": params["w2"], "w3": params["w3"],
            "w4_col": params["w4"].T, "b_packed": b_packed}


def reference_forward(x, params):
    """Pure-JAX reference (PyTorch layout) for correctness checking."""
    h = jnp.maximum(x @ params["w1"].T + params["b1"], 0.0)
    h = jnp.maximum(h @ params["w2"].T + params["b2"], 0.0)
    h = jnp.maximum(h @ params["w3"].T + params["b3"], 0.0)
    return h @ params["w4"].T + params["b4"]


if __name__ == "__main__":
    key = jax.random.PRNGKey(0)
    k_param, k_x = jax.random.split(key)

    batch = 1000          # not a multiple of 128 -> exercises the pad-free ragged-tail path
    input_size = 16       # 16 weather features per sample

    params = init_params(k_param, input_size)
    kparams = pack_kernel_params(params)
    x = jax.random.normal(k_x, (batch, input_size), jnp.float32)

    ref = reference_forward(x, params)

    # f32 path (default): auto tile_b -> 128, 8 grid steps.
    out = jax.block_until_ready(weather_model_forward(x, kparams))
    assert out.shape == (batch, 1), out.shape
    assert jnp.allclose(out, ref, atol=2e-3, rtol=2e-3), "f32 mismatch vs reference"

    # bf16 x / hidden weights (v6e/v7x MXU fast path), f32 accumulation.
    # NOTE: only safe when inputs are roughly normalized (they are here).
    out_bf16 = jax.block_until_ready(
        weather_model_forward(x, kparams, compute_dtype=jnp.bfloat16))
    assert out_bf16.shape == (batch, 1), out_bf16.shape
    assert jnp.allclose(out_bf16, ref, atol=5e-2, rtol=5e-2), "bf16 mismatch vs reference"

    # Explicit larger tile (what you'd use at large B on v5e/v6e/v7x).
    out_big = jax.block_until_ready(weather_model_forward(x, kparams, tile_b=512))
    assert jnp.allclose(out_big, ref, atol=2e-3, rtol=2e-3), "tile_b=512 mismatch"

    print("KERNEL_OK")
</pallas_src>

<mosaic_0001>
module attributes {stable_mosaic.version = 11 : i64} {
  func.func @weather_mlp_kernel(%arg0: i32, %arg1: memref<128x16xf32, #tpu.memory_space<vmem>>, %arg2: memref<64x16xf32, #tpu.memory_space<vmem>>, %arg3: memref<32x64xf32, #tpu.memory_space<vmem>>, %arg4: memref<16x32xf32, #tpu.memory_space<vmem>>, %arg5: memref<16x1xf32, #tpu.memory_space<vmem>>, %arg6: memref<120x1xf32, #tpu.memory_space<vmem>>, %arg7: memref<1x128xf32, #tpu.memory_space<vmem>>) attributes {dimension_semantics = [#tpu.dimension_semantics<parallel>], iteration_bounds = array<i64: 8>, scalar_prefetch = 0 : i64, scratch_operands = 0 : i64, tpu.core_type = #tpu.core_type<tc>, window_params = [{transform_indices = @transform_0, window_bounds = array<i64: 128, 16>}, {pipeline_mode = #tpu.pipeline_mode<synchronous>, transform_indices = @transform_1, window_bounds = array<i64: 64, 16>}, {pipeline_mode = #tpu.pipeline_mode<synchronous>, transform_indices = @transform_2, window_bounds = array<i64: 32, 64>}, {pipeline_mode = #tpu.pipeline_mode<synchronous>, transform_indices = @transform_3, window_bounds = array<i64: 16, 32>}, {pipeline_mode = #tpu.pipeline_mode<synchronous>, transform_indices = @transform_4, window_bounds = array<i64: 16, 1>}, {pipeline_mode = #tpu.pipeline_mode<synchronous>, transform_indices = @transform_5, window_bounds = array<i64: 120, 1>}, {transform_indices = @transform_6, window_bounds = array<i64: 1, 128>}]} {
    %c0 = arith.constant 0 : index
    %c0_0 = arith.constant 0 : index
    %0 = vector.load %arg6[%c0, %c0_0] : memref<120x1xf32, #tpu.memory_space<vmem>>, vector<64x1xf32>
    %c64 = arith.constant 64 : index
    %c0_1 = arith.constant 0 : index
    %1 = vector.load %arg6[%c64, %c0_1] : memref<120x1xf32, #tpu.memory_space<vmem>>, vector<32x1xf32>
    %c96 = arith.constant 96 : index
    %c0_2 = arith.constant 0 : index
    %2 = vector.load %arg6[%c96, %c0_2] : memref<120x1xf32, #tpu.memory_space<vmem>>, vector<16x1xf32>
    %c112 = arith.constant 112 : index
    %c0_3 = arith.constant 0 : index
    %3 = vector.load %arg6[%c112, %c0_3] : memref<120x1xf32, #tpu.memory_space<vmem>>, vector<1x1xf32>
    %c0_4 = arith.constant 0 : index
    %c0_5 = arith.constant 0 : index
    %4 = vector.load %arg2[%c0_4, %c0_5] : memref<64x16xf32, #tpu.memory_space<vmem>>, vector<64x16xf32>
    %c0_6 = arith.constant 0 : index
    %c0_7 = arith.constant 0 : index
    %5 = vector.load %arg1[%c0_6, %c0_7] : memref<128x16xf32, #tpu.memory_space<vmem>>, vector<128x16xf32>
    %cst = arith.constant dense<0.000000e+00> : vector<64x128xf32>
    %6 = tpu.matmul %4, %5, %cst {dimension_numbers = #tpu.dot_dimension_numbers<[1], [1], [0], [0], [0, 0, 1, 0], [], []>} : vector<64x16xf32>, vector<128x16xf32>, vector<64x128xf32> -> vector<64x128xf32>
    %7 = vector.broadcast %0 : vector<64x1xf32> to vector<64x128xf32>
    %8 = arith.addf %6, %7 : vector<64x128xf32>
    %cst_8 = arith.constant 0.000000e+00 : f32
    %9 = vector.broadcast %cst_8 : f32 to vector<64x128xf32>
    %10 = arith.maximumf %8, %9 : vector<64x128xf32>
    %c0_9 = arith.constant 0 : index
    %c0_10 = arith.constant 0 : index
    %11 = vector.load %arg3[%c0_9, %c0_10] : memref<32x64xf32, #tpu.memory_space<vmem>>, vector<32x64xf32>
    %cst_11 = arith.constant dense<0.000000e+00> : vector<32x128xf32>
    %12 = tpu.matmul %11, %10, %cst_11 {dimension_numbers = #tpu.dot_dimension_numbers<[1], [0], [0], [1], [0, 0, 1, 1], [], []>} : vector<32x64xf32>, vector<64x128xf32>, vector<32x128xf32> -> vector<32x128xf32>
    %13 = vector.broadcast %1 : vector<32x1xf32> to vector<32x128xf32>
    %14 = arith.addf %12, %13 : vector<32x128xf32>
    %cst_12 = arith.constant 0.000000e+00 : f32
    %15 = vector.broadcast %cst_12 : f32 to vector<32x128xf32>
    %16 = arith.maximumf %14, %15 : vector<32x128xf32>
    %c0_13 = arith.constant 0 : index
    %c0_14 = arith.constant 0 : index
    %17 = vector.load %arg4[%c0_13, %c0_14] : memref<16x32xf32, #tpu.memory_space<vmem>>, vector<16x32xf32>
    %cst_15 = arith.constant dense<0.000000e+00> : vector<16x128xf32>
    %18 = tpu.matmul %17, %16, %cst_15 {dimension_numbers = #tpu.dot_dimension_numbers<[1], [0], [0], [1], [0, 0, 1, 1], [], []>} : vector<16x32xf32>, vector<32x128xf32>, vector<16x128xf32> -> vector<16x128xf32>
    %19 = vector.broadcast %2 : vector<16x1xf32> to vector<16x128xf32>
    %20 = arith.addf %18, %19 : vector<16x128xf32>
    %cst_16 = arith.constant 0.000000e+00 : f32
    %21 = vector.broadcast %cst_16 : f32 to vector<16x128xf32>
    %22 = arith.maximumf %20, %21 : vector<16x128xf32>
    %c0_17 = arith.constant 0 : index
    %c0_18 = arith.constant 0 : index
    %23 = vector.load %arg5[%c0_17, %c0_18] : memref<16x1xf32, #tpu.memory_space<vmem>>, vector<16x1xf32>
    %24 = vector.broadcast %23 : vector<16x1xf32> to vector<16x128xf32>
    %25 = arith.mulf %22, %24 : vector<16x128xf32>
    %cst_19 = arith.constant dense<0.000000e+00> : vector<128xf32>
    %26 = vector.multi_reduction <add>, %25, %cst_19 [0] : vector<16x128xf32> to vector<128xf32>
    %27 = vector.shape_cast %26 : vector<128xf32> to vector<1x128xf32>
    %28 = vector.broadcast %3 : vector<1x1xf32> to vector<1x128xf32>
    %29 = arith.addf %27, %28 : vector<1x128xf32>
    %c0_20 = arith.constant 0 : index
    %c0_21 = arith.constant 0 : index
    %30 = vector.load %arg7[%c0_20, %c0_21] : memref<1x128xf32, #tpu.memory_space<vmem>>, vector<1x128xf32>
    tpu.vector_store %arg7[%c0_20, %c0_21], %29 {strides = array<i32>} : memref<1x128xf32, #tpu.memory_space<vmem>>, vector<1x128xf32>,
    return
  }
  func.func @transform_0(%arg0: i32) -> (i32, i32) {
    %c0_i32 = arith.constant 0 : i32
    %c0_i32_0 = arith.constant 0 : i32
    return %arg0, %c0_i32 : i32, i32
  }
  func.func @transform_1(%arg0: i32) -> (i32, i32) {
    %c0_i32 = arith.constant 0 : i32
    %c0_i32_0 = arith.constant 0 : i32
    %c0_i32_1 = arith.constant 0 : i32
    return %c0_i32, %c0_i32_0 : i32, i32
  }
  func.func @transform_2(%arg0: i32) -> (i32, i32) {
    %c0_i32 = arith.constant 0 : i32
    %c0_i32_0 = arith.constant 0 : i32
    %c0_i32_1 = arith.constant 0 : i32
    return %c0_i32, %c0_i32_0 : i32, i32
  }
  func.func @transform_3(%arg0: i32) -> (i32, i32) {
    %c0_i32 = arith.constant 0 : i32
    %c0_i32_0 = arith.constant 0 : i32
    %c0_i32_1 = arith.constant 0 : i32
    return %c0_i32, %c0_i32_0 : i32, i32
  }
  func.func @transform_4(%arg0: i32) -> (i32, i32) {
    %c0_i32 = arith.constant 0 : i32
    %c0_i32_0 = arith.constant 0 : i32
    %c0_i32_1 = arith.constant 0 : i32
    return %c0_i32, %c0_i32_0 : i32, i32
  }
  func.func @transform_5(%arg0: i32) -> (i32, i32) {
    %c0_i32 = arith.constant 0 : i32
    %c0_i32_0 = arith.constant 0 : i32
    %c0_i32_1 = arith.constant 0 : i32
    return %c0_i32, %c0_i32_0 : i32, i32
  }
  func.func @transform_6(%arg0: i32) -> (i32, i32) {
    %c0_i32 = arith.constant 0 : i32
    %c0_i32_0 = arith.constant 0 : i32
    return %c0_i32, %arg0 : i32, i32
  }
}

</mosaic_0001>

<bundles_post_ra>
// kernel: tpu_custom_call.1
= control target key start
LH: loop header
LB: loop body
LE: loop exit
PB: predicated region body
PF: predicated region fallthrough
CT: control target
= control target key end

     0   :  { %11 = vsyncpa [#allocation3], 0  ;;  %s1114_s0 = inlined_call_operand.vmem [shape: f32[1000,16], index: 0, kind: input, shape index: {}]   ;;  %s1115_s1 = inlined_call_operand.vmem [shape: f32[64,16], index: 1, kind: input, shape index: {}]   ;;  %s1116_s2 = inlined_call_operand.vmem [shape: f32[32,64], index: 2, kind: input, shape index: {}]   ;;  %s1117_s3 = inlined_call_operand.vmem [shape: f32[16,32], index: 3, kind: input, shape index: {}]   ;;  %s1118_s4 = inlined_call_operand.vmem [shape: f32[16,1], index: 4, kind: input, shape index: {}]   ;;  %s1119_s5 = inlined_call_operand.vmem [shape: f32[120,1], index: 5, kind: input, shape index: {}]   ;;  %s1120_s6 = inlined_call_operand.hbm [shape: f32[1,1000], index: 6, kind: output, shape index: {}]  }
   0x1   :  { %13 = vsyncpa [#allocation3 + $0x1], 0  ;;  %s879_s21 = smov 0   ;;  %s881_s22 = smov 0  }
   0x2   :  { %s883_s23 = smov 0   ;;  %s885_s24 = smov 0  }
   0x3 LB: > { %s900_s25 = sadd.s32 4294967295, %s841_s24   ;;  %s682_s26 = sadd.s32 4294967294, %s841_s24   ;;  %s841_s24 = sphi %s885_s24, %s1126_s24   ;;  %s837_s23 = sphi %s883_s23, %s1125_s23   ;;  %s833_s22 = sphi %s881_s22, %s1124_s22   ;;  %s829_s21 = sphi %s879_s21, %s1123_s21  }
   0x4   : > { %s904_s27 = sadd.s32 1, %s841_s24   ;;  %s157_s28 = sadd.s32 1, %s837_s23 }
   0x5   : > { %s154_s29 = ssub.s32 %s841_s24, %s904_s27  ;;  %p167_p0 = scmp.ne.s32.totalorder %s837_s23, %s833_s22 }
   0x6   : > { %p155_p1 = scmp.eq.s32.totalorder %s154_s29, 0  ;;  %p168_p2 = scmp.eq.s32.totalorder %s900_s25, 7 }
   0x7   : > { %p173_p3 = scmp.ne.s32.totalorder %s833_s22, %s829_s21  ;;  %p174_p4 = scmp.eq.s32.totalorder %s682_s26, 7 }
   0x8   : > { %s915_s30 = scalar_select %p155_p1, %s837_s23, %s157_s28  }
   0x9   : > { %p917_p5 = por %p168_p2, %p167_p0  ;;  %p921_p6 = por %p174_p4, %p173_p3 }
   0xa   : > { %p685_p7 = scmp.ge.s32.totalorder %s841_s24, 1  ;;  %p224_p8 = scmp.lt.s32.totalorder %s841_s24, 9 }
   0xc   : > { %p225_p9 = pnand %p685_p7, %p224_p8 }
   0xd   : > { %s686_s9 = sshll.u32 (!%p225_p9), %s900_s25, 4  ;;  %s255_s16 = sand.u32 (!%p225_p9), 1, %s833_s22  }
   0xe   : > { %228 = sbr.rel (%p225_p9) target bundleno = 611 (0x263), region = 44  ;;  %p262_p10 = scmp.lt.s32.totalorder (!%p225_p9), %s686_s9, 124 }
   0xf   : > { %s623_s19 = scalar_lea.hbm (!%p225_p9), %s1120_s6, %s900_s25  ;;  %s256_s20 = scalar_lea.vmem (!%p225_p9), [#allocation2], %s255_s16 }
  0x10   : > { %s625_s26 = sshll.u32 (!%p225_p9), %s256_s20, 4  ;;  %s627_s28 = sshll.u32 (!%p225_p9), %s623_s19, 4  ;;  %s626_s26 = int_to_ptr.vmem [resolvable:$true] %s625_s26  ;;  %s628_s28 = int_to_ptr.hbm [resolvable:$true] %s627_s28 }
  0x11   : > { %s615_s29 = scalar_lea.sflag (!%p225_p9), [#allocation3], %s255_s16  ;;  %s799_s12 = scalar_lea.hbm (!%p225_p9), %s1120_s6, 8 }
  0x13   : > { %s1128_s9 = smov (!%p262_p10, %s686_s9), 124  ;;  %vm350_vm0 = vcmask 130048   ;;  %v843_v9 = vmov 0   ;;  %v278_v10 = vld [vmem:[%s1119_s5 + $0x38] sm:$0xff]  ;;  %v277_v13 = vld [vmem:[%s1119_s5 + $0x30] sm:$0xff]  ;;  %v272_v16 = vld [vmem:[%s1119_s5 + $0x8] sm:$0xff] }
  0x14   : > { %s687_s10 = sshll.u32 %s1128_s9, 3  ;;  %776 = vset.pattern.permute.xlu0 %v843_v9  ;;  %777 = vset.pattern.permute.xlu1 %v843_v9  ;;  %v276_v17 = vld [vmem:[%s1119_s5 + $0x28] sm:$0xff]  ;;  %v275_v20 = vld [vmem:[%s1119_s5 + $0x20] sm:$0xff]  ;;  %v288_v24 = vld [vmem:[%s1115_s1 + $0x10] sm:$0xff]  ;;  %vm496_vm1 = vcmask 523264   ;;  %vm554_vm2 = vcmask 261120  }
  0x15   : > { %s931_s13 = scalar_lea.vmem %s1114_s0, %s687_s10  ;;  %778 = vset.pattern.permute.xlu2 %v843_v9  ;;  %347 = vperm.xlu0 %776, %v278_v10   ;;  %v287_v22 = vld [vmem:[%s1115_s1 + $0x8] sm:$0xff]  ;;  %v271_v23 = vld [vmem:[%s1119_s5] sm:$0xff]  ;;  %v274_v25 = vld [vmem:[%s1119_s5 + $0x18] sm:$0xff]  ;;  %s793_s9 = sshra.s32 %s628_s28, 4  ;;  %s794_s9 = int_to_ptr.hbm [resolvable:$true] %s793_s9 }
  0x16   : > { %v309_v0 = vld [vmem:[%s931_s13 + $0x78] sm:$0xff]  ;;  %v308_v1 = vld [vmem:[%s931_s13 + $0x70] sm:$0xff]  ;;  %v307_v2 = vld [vmem:[%s931_s13 + $0x68] sm:$0xff]  ;;  %337 = vperm.xlu1 %777, %v276_v17   ;;  %327 = vperm.xlu2 %778, %v274_v25   ;;  %s795_s10 = scalar_lea.hbm %s794_s9, 1  ;;  %p800_p0 = scmp.lt.s32.totalorder %s794_s9, %s1120_s6 }
  0x17   : > { %720 = vmatpush.xpose.msk.msra.mxu3 %vm350_vm0, %v309_v0  ;;  %688 = vmatpush.xpose.msk.msra.mxu0 %vm350_vm0, %v309_v0  ;;  %v306_v3 = vld [vmem:[%s931_s13 + $0x60] sm:$0xff]  ;;  %v305_v4 = vld [vmem:[%s931_s13 + $0x58] sm:$0xff]  ;;  %v304_v5 = vld [vmem:[%s931_s13 + $0x50] sm:$0xff]  ;;  %p796_p11 = scmp.ne.s32.totalorder %s794_s9, %s795_s10  ;;  %p801_p1 = scmp.lt.s32.totalorder %s799_s12, %s795_s10 }
  0x18   : > { %v303_v6 = vld [vmem:[%s931_s13 + $0x48] sm:$0xff]  ;;  %v302_v7 = vld [vmem:[%s931_s13 + $0x40] sm:$0xff]  ;;  %v301_v8 = vld [vmem:[%s931_s13 + $0x38] sm:$0xff] }
  0x19   : > { %v300_v11 = vld [vmem:[%s931_s13 + $0x30] sm:$0xff]  ;;  %v299_v12 = vld [vmem:[%s931_s13 + $0x28] sm:$0xff]  ;;  %v298_v14 = vld [vmem:[%s931_s13 + $0x20] sm:$0xff]  ;;  %p797_p12 = pnand %p796_p11, %p917_p5  ;;  %p802_p2 = por %p801_p1, %p800_p0 }
  0x1a   : > { %v297_v15 = vld [vmem:[%s931_s13 + $0x18] sm:$0xff]  ;;  %v296_v18 = vld [vmem:[%s931_s13 + $0x10] sm:$0xff]  ;;  %v295_v19 = vld [vmem:[%s931_s13 + $0x8] sm:$0xff] }
  0x1b   : > { %721 = vmatpush.xpose.msk.msra.mxu3 %vm350_vm0, %v308_v1  ;;  %689 = vmatpush.xpose.msk.msra.mxu0 %vm350_vm0, %v308_v1  ;;  %v294_v21 = vld [vmem:[%s931_s13] sm:$0xff]  ;;  %v281_v26 = vld [vmem:[%s1119_s5 + $0x50] sm:$0xff]  ;;  %v280_v27 = vld [vmem:[%s1119_s5 + $0x48] sm:$0xff]  ;;  %p798_p13 = pneg %p797_p12 }
  0x1c   : > { %v289_v28 = vld [vmem:[%s1115_s1 + $0x18] sm:$0xff]  ;;  %v273_v29 = vld [vmem:[%s1119_s5 + $0x10] sm:$0xff]  ;;  %v283_v30 = vld [vmem:[%s1119_s5 + $0x60] sm:$0xff] }
  0x1d   : > { %342 = vperm.xlu0 %776, %v277_v13   ;;  %v286_v31 = vld [vmem:[%s1115_s1] sm:$0xff]  ;;  %v284_v32 = vld [vmem:[%s1119_s5 + $0x68] sm:$0xff]  ;;  %v282_v35 = vld [vmem:[%s1119_s5 + $0x58] sm:$0xff]  ;;  %p803_p3 = pnand %p802_p2, %p798_p13 }
  0x1e   : > { %332 = vperm.xlu1 %777, %v275_v20   ;;  %322 = vperm.xlu2 %778, %v273_v29   ;;  %v290_v33 = vld [vmem:[%s1115_s1 + $0x20] sm:$0xff]  ;;  %v587_v34 = vld [vmem:[%s1118_s4 + $0x8] sm:$0xff]  ;;  %v285_v36 = vld [vmem:[%s1119_s5 + $0x70] sm:$0x1] }
  0x1f   : > { %722 = vmatpush.xpose.msk.msra.mxu3 %vm350_vm0, %v307_v2  ;;  %690 = vmatpush.xpose.msk.msra.mxu0 %vm350_vm0, %v307_v2  ;;  %v291_v37 = vld [vmem:[%s1115_s1 + $0x28] sm:$0xff]  ;;  %v279_v38 = vld [vmem:[%s1119_s5 + $0x40] sm:$0xff]  ;;  %v292_v39 = vld [vmem:[%s1115_s1 + $0x30] sm:$0xff] }
  0x20   : > { %v586_v40 = vld [vmem:[%s1118_s4] sm:$0xff]  ;;  %v293_v41 = vld [vmem:[%s1115_s1 + $0x38] sm:$0xff] }
  0x21   : > { %v472_v10 = vld [vmem:[%s1116_s2] sm:$0xff]  ;;  %v475_v13 = vld [vmem:[%s1116_s2 + $0x18] sm:$0xff] }
  0x23   : > { %723 = vmatpush.xpose.msk.msra.mxu3 %vm350_vm0, %v306_v3  ;;  %691 = vmatpush.xpose.msk.msra.mxu0 %vm350_vm0, %v306_v3 }
  0x25   : > { %317 = vperm.xlu0 %776, %v272_v16  }
  0x26   : > { %312 = vperm.xlu1 %777, %v271_v23   ;;  %493 = vperm.xlu2 %778, %v282_v35  }
  0x27   : > { %724 = vmatpush.xpose.msk.msra.mxu3 %vm350_vm0, %v305_v4  ;;  %692 = vmatpush.xpose.msk.msra.mxu0 %vm350_vm0, %v305_v4 }
  0x2b   : > { %725 = vmatpush.xpose.msk.msra.mxu3 %vm350_vm0, %v304_v5  ;;  %693 = vmatpush.xpose.msk.msra.mxu0 %vm350_vm0, %v304_v5 }
  0x2d   : > { %488 = vperm.xlu0 %776, %v281_v26  }
  0x2e   : > { %483 = vperm.xlu1 %777, %v280_v27   ;;  %478 = vperm.xlu2 %778, %v279_v38  }
  0x2f   : > { %726 = vmatpush.xpose.msk.msra.mxu3 %vm350_vm0, %v303_v6  ;;  %694 = vmatpush.xpose.msk.msra.mxu0 %vm350_vm0, %v303_v6 }
  0x33   : > { %727 = vmatpush.xpose.msk.msra.mxu3 %vm350_vm0, %v302_v7  ;;  %695 = vmatpush.xpose.msk.msra.mxu0 %vm350_vm0, %v302_v7 }
  0x35   : > { %546 = vperm.xlu0 %776, %v283_v30   ;;  %v542_v30 = vld [vmem:[%s1117_s3] sm:$0xff] }
  0x36   : > { %551 = vperm.xlu1 %777, %v284_v32   ;;  %590 = vperm.xlu2 %778, %v586_v40  }
  0x37   : > { %728 = vmatpush.xpose.msk.msra.mxu3 %vm350_vm0, %v301_v8  ;;  %696 = vmatpush.xpose.msk.msra.mxu0 %vm350_vm0, %v301_v8 }
  0x3b   : > { %729 = vmatpush.xpose.msk.msra.mxu3 %vm350_vm0, %v300_v11  ;;  %697 = vmatpush.xpose.msk.msra.mxu0 %vm350_vm0, %v300_v11  ;;  %v473_v11 = vld [vmem:[%s1116_s2 + $0x8] sm:$0xff] }
  0x3d   : > { %595 = vperm.xlu0 %776, %v587_v34  }
  0x3e   : > { %609 = vperm.xlu1 %777, %v285_v36  }
  0x3f   : > { %730 = vmatpush.xpose.msk.msra.mxu3 %vm350_vm0, %v299_v12  ;;  %698 = vmatpush.xpose.msk.msra.mxu0 %vm350_vm0, %v299_v12  ;;  %v474_v12 = vld [vmem:[%s1116_s2 + $0x10] sm:$0xff] }
  0x43   : > { %731 = vmatpush.xpose.msk.msra.mxu3 %vm350_vm0, %v298_v14  ;;  %699 = vmatpush.xpose.msk.msra.mxu0 %vm350_vm0, %v298_v14 }
  0x47   : > { %732 = vmatpush.xpose.msk.msra.mxu3 %vm350_vm0, %v297_v15  ;;  %700 = vmatpush.xpose.msk.msra.mxu0 %vm350_vm0, %v297_v15 }
  0x4b   : > { %733 = vmatpush.xpose.msk.msra.mxu3 %vm350_vm0, %v296_v18  ;;  %701 = vmatpush.xpose.msk.msra.mxu0 %vm350_vm0, %v296_v18 }
  0x4f   : > { %734 = vmatpush.xpose.msk.msra.mxu3 %vm350_vm0, %v295_v19  ;;  %702 = vmatpush.xpose.msk.msra.mxu0 %vm350_vm0, %v295_v19 }
  0x53   : > { %735 = vmatpush.xpose.msk.msra.mxu3 %vm350_vm0, %v294_v21  ;;  %703 = vmatpush.xpose.msk.msra.mxu0 %vm350_vm0, %v294_v21 }
  0x56   : > { %705 = vmatmul.msk.f32.vlgmr.msra.gmra.mxu3 %vm350_vm0, %v287_v22  ;;  %704 = vmatmul.msk.f32.vlgmr.msra.gmra.mxu0 %vm350_vm0, %v286_v31  ;;  %v543_v31 = vld [vmem:[%s1117_s3 + $0x8] sm:$0xff] }
  0x5e   : > { %706 = vmatmul.msk.f32.gmra.mxu3 %vm350_vm0, %v288_v24 }
  0x66   : > { %707 = vmatmul.msk.f32.gmra.mxu3 %vm350_vm0, %v289_v28 }
  0x6e   : > { %708 = vmatmul.msk.f32.gmra.mxu3 %vm350_vm0, %v290_v33 }
  0x70   : > { %v328_v50 = vpop.permute.xlu2 %327 }
  0x76   : > { %709 = vmatmul.msk.f32.gmra.mxu3 %vm350_vm0, %v291_v37 }
  0x78   : > { %v323_v60 = vpop.permute.xlu2 %322 }
  0x7e   : > { %710 = vmatmul.msk.f32.gmra.mxu3 %vm350_vm0, %v292_v39 }
  0x80   : > { %v494_v17 = vpop.permute.xlu2 %493 }
  0x86   : > { %711 = vmatmul.msk.f32.gmra.mxu3 %vm350_vm0, %v293_v41 }
  0x87   : > { %v348_v47 = vpop.permute.xlu0 %347 }
  0x88   : > { %v338_v48 = vpop.permute.xlu1 %337  ;;  %v479_v25 = vpop.permute.xlu2 %478 }
  0x8f   : > { %v343_v51 = vpop.permute.xlu0 %342 }
  0x90   : > { %v333_v55 = vpop.permute.xlu1 %332  ;;  %v591_v41 = vpop.permute.xlu2 %590 }
  0x97   : > { %v318_v63 = vpop.permute.xlu0 %317 }
  0x98   : > { %v313_v5 = vpop.permute.xlu1 %312 }
  0x9f   : > { %v489_v18 = vpop.permute.xlu0 %488 }
  0xa0   : > { %v484_v22 = vpop.permute.xlu1 %483 }
  0xa7   : > { %v547_v33 = vpop.permute.xlu0 %546 }
  0xa8   : > { %v552_v35 = vpop.permute.xlu1 %551 }
  0xaf   : > { %v596_v40 = vpop.permute.xlu0 %595 }
  0xd3   : > { %v440_v2 = vpop.f32.mrf.mxu0 }
  0xd4   : > { %v441_v7 = vadd.f32 %v440_v2, %v313_v5 }
  0xd6   : > { %v464_v9 = vmax.f32 %v441_v7, 0.0 }
  0xd9   : > { %v443_v42 = vpop.f32.mrf.mxu3 }
  0xda   : > { %v444_v3 = vadd.f32 %v443_v42, %v318_v63 }
  0xdc   : > { %v465_v8 = vmax.f32 %v444_v3, 0.0 }
  0xe1   : > { %v446_v43 = vpop.f32.mrf.mxu3 }
  0xe2   : > { %v447_v0 = vadd.f32 %v446_v43, %v323_v60 }
  0xe4   : > { %v466_v6 = vmax.f32 %v447_v0, 0.0 }
  0xe9   : > { %v449_v44 = vpop.f32.mrf.mxu3 }
  0xea   : > { %v450_v61 = vadd.f32 %v449_v44, %v328_v50 }
  0xec   : > { %v467_v4 = vmax.f32 %v450_v61, 0.0 }
  0xf1   : > { %v452_v45 = vpop.f32.mrf.mxu3 }
  0xf2   : > { %v453_v58 = vadd.f32 %v452_v45, %v333_v55 }
  0xf4   : > { %v468_v1 = vmax.f32 %v453_v58, 0.0 }
  0xf9   : > { %v455_v46 = vpop.f32.mrf.mxu3 }
  0xfa   : > { %v456_v56 = vadd.f32 %v455_v46, %v338_v48 }
  0xfc   : > { %v469_v62 = vmax.f32 %v456_v56, 0.0 }
 0x101   : > { %v458_v49 = vpop.f32.mrf.mxu3 }
 0x102   : > { %v459_v53 = vadd.f32 %v458_v49, %v343_v51  ;;  %v610_v51 = vpop.permute.xlu1 %609 }
 0x104   : > { %v470_v59 = vmax.f32 %v459_v53, 0.0 }
 0x109   : > { %v461_v52 = vpop.f32.mrf.mxu3 }
 0x10a   : > { %v462_v54 = vadd.f32 %v461_v52, %v348_v47 }
 0x10c   : > { %v471_v57 = vmax.f32 %v462_v54, 0.0 }
 0x10e   : > { %517 = vmatpush.msra.mxu1 %v471_v57 }
 0x110   : > { %518 = vmatpush.msra.mxu1 %v470_v59 }
 0x112   : > { %519 = vmatpush.msra.mxu1 %v469_v62 }
 0x114   : > { %520 = vmatpush.msra.mxu1 %v468_v1 }
 0x116   : > { %521 = vmatpush.msra.mxu1 %v467_v4 }
 0x118   : > { %522 = vmatpush.msra.mxu1 %v466_v6 }
 0x11a   : > { %523 = vmatpush.msra.mxu1 %v465_v8 }
 0x11c   : > { %524 = vmatpush.msra.mxu1 %v464_v9 }
 0x11d   : > { %712 = vmatmul.msk.f32.vlgmr.msra.gmra.mxu1 %vm496_vm1, %v472_v10 }
 0x125   : > { %713 = vmatmul.msk.f32.gmra.mxu1 %vm496_vm1, %v473_v11 }
 0x12d   : > { %714 = vmatmul.msk.f32.gmra.mxu1 %vm496_vm1, %v474_v12 }
 0x135   : > { %715 = vmatmul.msk.f32.gmra.mxu1 %vm496_vm1, %v475_v13 }
 0x19a   : > { %v526_v14 = vpop.f32.mrf.mxu1 }
 0x19b   : > { %v527_v26 = vadd.f32 %v526_v14, %v479_v25 }
 0x19d   : > { %v538_v29 = vmax.f32 %v527_v26, 0.0 }
 0x1a2   : > { %v529_v15 = vpop.f32.mrf.mxu1 }
 0x1a3   : > { %v530_v23 = vadd.f32 %v529_v15, %v484_v22 }
 0x1a5   : > { %v539_v28 = vmax.f32 %v530_v23, 0.0 }
 0x1aa   : > { %v532_v16 = vpop.f32.mrf.mxu1 }
 0x1ab   : > { %v533_v20 = vadd.f32 %v532_v16, %v489_v18 }
 0x1ad   : > { %v540_v27 = vmax.f32 %v533_v20, 0.0 }
 0x1b2   : > { %v535_v19 = vpop.f32.mrf.mxu1 }
 0x1b3   : > { %v536_v21 = vadd.f32 %v535_v19, %v494_v17 }
 0x1b5   : > { %v541_v24 = vmax.f32 %v536_v21, 0.0 }
 0x1b7   : > { %573 = vmatpush.msra.mxu2 %v541_v24 }
 0x1b9   : > { %574 = vmatpush.msra.mxu2 %v540_v27 }
 0x1bb   : > { %575 = vmatpush.msra.mxu2 %v539_v28 }
 0x1bd   : > { %576 = vmatpush.msra.mxu2 %v538_v29 }
 0x1be   : > { %716 = vmatmul.msk.f32.vlgmr.msra.gmra.mxu2 %vm554_vm2, %v542_v30 }
 0x1c6   : > { %717 = vmatmul.msk.f32.gmra.mxu2 %vm554_vm2, %v543_v31 }
 0x241   : > { %v578_v32 = vpop.f32.mrf.mxu2 }
 0x242   : > { %v579_v34 = vadd.f32 %v578_v32, %v547_v33 }
 0x244   : > { %v584_v37 = vmax.f32 %v579_v34, 0.0 }
 0x246   : > { %v598_v42 = vmul.f32 %v591_v41, %v584_v37 }
 0x249   : > { %v581_v36 = vpop.f32.mrf.mxu2 }
 0x24a   : > { %v582_v38 = vadd.f32 %v581_v36, %v552_v35 }
 0x24c   : > { %v585_v39 = vmax.f32 %v582_v38, 0.0 }
 0x24e   : > { %v599_v43 = vmul.f32 %v596_v40, %v585_v39 }
 0x250   : > { %v600_v44 = vadd.f32 %v599_v43, %v598_v42 }
 0x252   : > { %v601_v45 = vrot.slane %v600_v44, 4 }
 0x254   : > { %v602_v46 = vadd.f32 %v601_v45, %v600_v44 }
 0x256   : > { %v603_v47 = vrot.slane %v602_v46, 2 }
 0x258   : > { %v604_v48 = vadd.f32 %v603_v47, %v602_v46 }
 0x25a   : > { %v605_v49 = vrot.slane %v604_v48, 1 }
 0x25c   : > { %v606_v50 = vadd.f32 %v605_v49, %v604_v48 }
 0x25e   : > { %v612_v52 = vadd.f32 %v610_v51, %v606_v50 }
 0x260   : > { %613 = vst [vmem:[%s256_s20] sm:$0x1] %v612_v52 }
 0x261   : > { %806 = shalt.err (!%p803_p3)
}
 0x262   : > { %736 = dma.vmem_to_hbm [thread:$0]  (%p917_p5), %s626_s26, 16, %s628_s28, %s615_s29  }
 0x263 PF: > { %p742_p4 = scmp.ge.s32.totalorder %s841_s24, 2  ;;  %s639_s15 = sand.u32 1, %s829_s21  }
 0x264   : > { %s640_s16 = scalar_lea.sflag [#allocation3], %s639_s15 }
 0x265   : > { %p739_p7 = pnand %p742_p4, %p921_p6 }
 0x267   : > { %p740_p8 = pneg %p739_p7 }
 0x269   : > { %824 = dma.done.wait (%p740_p8), %s640_s16, 16  }
 0x26a   : > { %826 = vsyncadd (%p740_p8), %s640_s16, 4294967280  ;;  %p16_p9 = scmp.ge.s32.totalorder %s904_s27, 10   ;;  %s1123_s21 = smov %s833_s22 }
 0x26b   : > { %s1124_s22 = smov %s837_s23  ;;  %s1125_s23 = smov %s915_s30 }
 0x26c   : > { %s1126_s24 = smov %s904_s27  ;;  %18 = sbr.rel (!%p16_p9) target bundleno = 3 (0x3), region = 79 }
 0x271   :  { %645 = vsyncpa [#allocation3], 1 }
 0x272   :  { %647 = vsyncpa [#allocation3 + $0x1], 1 }

</bundles_post_ra>
